<compile_context>
chip_gen: v6e
topology: v6e:2x2x1
jax: 0.10.0
libtpu: 0.0.40
codegen_flags: <defaults>
</compile_context>

<pallas_src>
import functools
import math

import jax
import jax.numpy as jnp
from jax.experimental import pallas as pl
from jax.experimental.pallas import tpu as pltpu

LANE = 128
SUBLANE = 8
_MIB = 1 << 20


def _round_up(x, m):
    return ((x + m - 1) // m) * m


def _pad_to(a, shape):
    pads = [(0, s - d) for d, s in zip(a.shape, shape)]
    if all(p == (0, 0) for p in pads):
        return a
    return jnp.pad(a, pads)


def _tpu_vmem_budgets():
    """Generation-aware (vmem_limit_cap, resident_weight_budget) in bytes."""
    phys = None
    try:
        info = pltpu.get_tpu_info()
        phys = getattr(info, "vmem_capacity_bytes", None)
    except Exception:
        phys = None
    if phys is None:
        phys = 64 * _MIB                      # conservative (v7x-sized) default
    if phys >= 96 * _MIB:                     # v5e / v6e: 128 MiB per TensorCore
        return 100 * _MIB, 72 * _MIB
    # v7x: 64 MiB per TensorCore; leave headroom for compiler internal scratch.
    return 56 * _MIB, 24 * _MIB


# ------------------------------- kernels ----------------------------------- #

def _dsmlp_resident_kernel(inter_p, x_ref, w13_ref, b13_ref, w2_ref, b2_ref, o_ref):
    """All weights resident in VMEM (single-buffered); one fused W1|W3 matmul."""
    x = x_ref[...]
    h = jnp.dot(x, w13_ref[...], preferred_element_type=jnp.float32) + b13_ref[...]
    h1 = h[:, :inter_p]                       # W1 branch
    h3 = h[:, inter_p:]                       # W3 (gate) branch
    g = (h1 * jax.nn.sigmoid(h1)) * h3        # SiLU(h1) * h3 in f32 (VPU + EUP)
    out = jnp.dot(g.astype(w2_ref.dtype), w2_ref[...],
                  preferred_element_type=jnp.float32)
    o_ref[...] = (out + b2_ref[...]).astype(o_ref.dtype)


def _dsmlp_tiled_kernel(tk, x_ref, w13_ref, b13_ref, w2_ref, b2_ref, o_ref, acc_ref):
    """(M, N, K)-tiled path.  K (inter_channels) is the last, 'arbitrary' grid axis;
    partial W2 products accumulate into a resident f32 VMEM scratch per (M, N) tile;
    finalize adds b2 and casts."""
    k = pl.program_id(2)

    @pl.when(k == 0)
    def _():
        acc_ref[...] = jnp.zeros_like(acc_ref)

    h = jnp.dot(x_ref[...], w13_ref[...],
                preferred_element_type=jnp.float32) + b13_ref[...]
    h1 = h[:, :tk]
    h3 = h[:, tk:]
    g = (h1 * jax.nn.sigmoid(h1)) * h3
    acc_ref[...] += jnp.dot(g.astype(w2_ref.dtype), w2_ref[...],
                            preferred_element_type=jnp.float32)

    @pl.when(k == pl.num_programs(2) - 1)
    def _():
        o_ref[...] = (acc_ref[...] + b2_ref[...]).astype(o_ref.dtype)


# --------------------------- one-time weight packing ------------------------ #

def prepare_dsmlp_params(w1, b1, w3, b3, w2, b2, *,
                         mxu_dtype=jnp.bfloat16,      # bf16 MXU operands by default
                         force_tiled=False,
                         tk_inter=512,                # inter_channels tile (tiled path)
                         tn_out=1024,                 # out_channels tile (tiled path)
                         plan_tm=256):
    """One-time repacking of the DSMLP weights (pad, cast, W1|W3 fusion, per-k tile
    layout).  Call once and reuse the returned pack across forward calls; this keeps
    the per-step HBM traffic down to x + (resident or streamed) weights only."""
    in_c, inter_c = w1.shape
    out_c = w2.shape[1]
    compute_dtype = jnp.dtype(mxu_dtype)
    itemsize = compute_dtype.itemsize

    vmem_cap, resident_budget = _tpu_vmem_budgets()

    in_p = _round_up(in_c, LANE)
    inter_lane = _round_up(inter_c, LANE)
    out_lane = _round_up(out_c, LANE)

    # Resident feasibility: weights resident (single copy) + double-buffered x/out
    # tiles + f32 intermediates at the planning row tile.
    resident_weight_bytes = (2 * in_p * inter_lane + inter_lane * out_lane) * itemsize
    resident_need = (
        resident_weight_bytes
        + (2 * inter_lane + out_lane) * 4                       # biases (f32)
        + 2 * plan_tm * (in_p * itemsize + out_lane * 4)        # pipelined x / out tiles
        + plan_tm * (3 * inter_lane + out_lane) * 4             # h, g, out (f32)
        + plan_tm * inter_lane * itemsize)                      # g cast for 2nd matmul
    use_tiled = (force_tiled
                 or resident_weight_bytes > resident_budget
                 or resident_need > int(0.9 * vmem_cap))

    pack = dict(in_c=in_c, inter_c=inter_c, out_c=out_c, in_p=in_p,
                compute_dtype=compute_dtype, vmem_cap=vmem_cap, tiled=use_tiled)

    b1r = b1.reshape(1, -1).astype(jnp.float32)
    b3r = b3.reshape(1, -1).astype(jnp.float32)
    b2r = b2.reshape(1, -1).astype(jnp.float32)

    if not use_tiled:
        inter_p, out_p = inter_lane, out_lane
        w1p = _pad_to(w1, (in_p, inter_p)).astype(compute_dtype)
        w3p = _pad_to(w3, (in_p, inter_p)).astype(compute_dtype)
        pack.update(
            inter_p=inter_p, out_p=out_p,
            w13=jnp.concatenate([w1p, w3p], axis=1),              # (in_p, 2*inter_p)
            b13=jnp.concatenate([_pad_to(b1r, (1, inter_p)),
                                 _pad_to(b3r, (1, inter_p))], axis=1),
            w2=_pad_to(w2, (inter_p, out_p)).astype(compute_dtype),
            b2=_pad_to(b2r, (1, out_p)),
        )
        return pack

    # Tiled path: inter_channels (K, reduction) and out_channels (N) both tiled.
    # NOTE(v7x decode shapes): fp8(e4m3) weight storage with per-channel scales would
    # further halve streamed weight bytes; not implemented here.
    tk = _round_up(min(tk_inter, inter_lane), LANE)
    tn = _round_up(min(tn_out, out_lane), LANE)
    inter_p = _round_up(inter_c, tk)
    out_p = _round_up(out_c, tn)
    nk = inter_p // tk

    w1p = _pad_to(w1, (in_p, inter_p)).astype(compute_dtype)
    w3p = _pad_to(w3, (in_p, inter_p)).astype(compute_dtype)
    # Per-k fused tile: w13_t[k] = [ W1[:, k*tk:(k+1)*tk] | W3[:, k*tk:(k+1)*tk] ]
    w13_t = jnp.concatenate([w1p.reshape(in_p, nk, tk),
                             w3p.reshape(in_p, nk, tk)], axis=2)
    w13_t = jnp.transpose(w13_t, (1, 0, 2))                       # (nk, in_p, 2*tk)
    b13_t = jnp.concatenate([_pad_to(b1r, (1, inter_p)).reshape(nk, tk),
                             _pad_to(b3r, (1, inter_p)).reshape(nk, tk)],
                            axis=1).reshape(nk, 1, 2 * tk)
    pack.update(
        inter_p=inter_p, out_p=out_p, tk=tk, tn=tn, nk=nk,
        w13=w13_t, b13=b13_t,
        w2=_pad_to(w2, (inter_p, out_p)).astype(compute_dtype),
        b2=_pad_to(b2r, (1, out_p)),
    )
    return pack


# ------------------------------- forward ----------------------------------- #

def dsmlp_apply(x, pack, *, tm=None):
    """DSMLP forward with pre-packed weights.  x: (..., in_channel)."""
    orig_shape = x.shape
    in_c, out_c = pack["in_c"], pack["out_c"]
    assert orig_shape[-1] == in_c, "last dim of x must equal in_channel"
    out_dtype = x.dtype
    compute_dtype = pack["compute_dtype"]
    itemsize = compute_dtype.itemsize
    out_itemsize = jnp.dtype(out_dtype).itemsize
    in_p, inter_p, out_p = pack["in_p"], pack["inter_p"], pack["out_p"]
    vmem_cap = pack["vmem_cap"]

    M = math.prod(orig_shape[:-1]) if len(orig_shape) > 1 else 1
    x2 = x.reshape(M, in_c)

    if tm is None:
        # Tiled path streams all weights grid_m times -> bigger row tile directly cuts
        # the dominant HBM traffic; resident path keeps a moderate MXU-friendly tile.
        tm = 512 if pack["tiled"] else 256
    tm_eff = max(SUBLANE, min(tm, _round_up(M, SUBLANE)))
    m_pad = _round_up(M, tm_eff)
    grid_m = m_pad // tm_eff

    xp = _pad_to(x2, (m_pad, in_p)).astype(compute_dtype)

    vmem_full = pl.BlockSpec(memory_space=pltpu.MemorySpace.VMEM)

    if not pack["tiled"]:
        w13, b13, w2p, b2p = pack["w13"], pack["b13"], pack["w2"], pack["b2"]
        vmem_need = (
            (w13.size + w2p.size) * itemsize                          # resident weights (x1)
            + (b13.size + b2p.size) * 4                               # biases (f32)
            + 2 * tm_eff * (in_p * itemsize + out_p * out_itemsize)   # pipelined x / out tiles
            + tm_eff * (3 * inter_p + out_p) * 4                      # h, g, out (f32)
            + tm_eff * inter_p * itemsize)                            # g cast for 2nd matmul
        vmem_limit = int(min(max(vmem_need + 4 * _MIB, 32 * _MIB), vmem_cap))
        flops = int(2 * m_pad * (2 * in_p * inter_p + inter_p * out_p))
        transcendentals = int(m_pad * inter_p)
        bytes_accessed = int((xp.size + w13.size + w2p.size) * itemsize
                             + (b13.size + b2p.size) * 4
                             + m_pad * out_p * out_itemsize)

        out_pad = pl.pallas_call(
            functools.partial(_dsmlp_resident_kernel, inter_p),
            out_shape=jax.ShapeDtypeStruct((m_pad, out_p), out_dtype),
            grid_spec=pltpu.PrefetchScalarGridSpec(
                num_scalar_prefetch=0,
                grid=(grid_m,),
                in_specs=[
                    pl.BlockSpec((tm_eff, in_p), lambda i: (i, 0)),   # x rows
                    vmem_full,                                        # fused W1|W3 (resident)
                    vmem_full,                                        # fused b1|b3
                    vmem_full,                                        # W2
                    vmem_full,                                        # b2
                ],
                out_specs=pl.BlockSpec((tm_eff, out_p), lambda i: (i, 0)),
            ),
            compiler_params=pltpu.CompilerParams(
                dimension_semantics=("parallel",),
                vmem_limit_bytes=vmem_limit),
            cost_estimate=pl.CostEstimate(
                flops=flops, transcendentals=transcendentals,
                bytes_accessed=bytes_accessed),
        )(xp, w13, b13, w2p, b2p)
    else:
        w13_t, b13_t, w2p, b2p = pack["w13"], pack["b13"], pack["w2"], pack["b2"]
        tk, tn, nk = pack["tk"], pack["tn"], pack["nk"]
        n_out = out_p // tn

        vmem_need = (
            2 * tm_eff * in_p * itemsize                        # x tiles (double-buffered)
            + 2 * (in_p * 2 * tk + tk * tn) * itemsize          # W1|W3 / W2 tiles
            + 2 * (2 * tk + tn) * 4                             # bias tiles (f32)
            + 2 * tm_eff * tn * out_itemsize                    # out tiles
            + tm_eff * tn * 4                                   # f32 accumulator
            + tm_eff * (3 * tk + tn) * 4                        # h, g, partial (f32)
            + tm_eff * tk * itemsize)                           # g cast for 2nd matmul
        vmem_limit = int(min(max(vmem_need + 4 * _MIB, 32 * _MIB), vmem_cap))
        flops = int(2 * m_pad * (n_out * 2 * in_p * inter_p + inter_p * out_p))
        transcendentals = int(m_pad * inter_p * n_out)
        bytes_accessed = int(xp.size * itemsize
                             + grid_m * n_out * w13_t.size * itemsize
                             + grid_m * w2p.size * itemsize
                             + (b13_t.size + b2p.size) * 4
                             + m_pad * out_p * out_itemsize)

        out_pad = pl.pallas_call(
            functools.partial(_dsmlp_tiled_kernel, tk),
            out_shape=jax.ShapeDtypeStruct((m_pad, out_p), out_dtype),
            grid_spec=pltpu.PrefetchScalarGridSpec(
                num_scalar_prefetch=0,
                grid=(grid_m, n_out, nk),
                in_specs=[
                    pl.BlockSpec((tm_eff, in_p), lambda i, j, k: (i, 0)),       # x rows
                    pl.BlockSpec((pl.Squeezed(), in_p, 2 * tk),
                                 lambda i, j, k: (k, 0, 0)),                     # fused W1|W3 k-tile
                    pl.BlockSpec((pl.Squeezed(), 1, 2 * tk),
                                 lambda i, j, k: (k, 0, 0)),                     # fused b1|b3 k-tile
                    pl.BlockSpec((tk, tn), lambda i, j, k: (k, j)),              # W2 (k, n) tile
                    pl.BlockSpec((1, tn), lambda i, j, k: (0, j)),               # b2 n-tile
                ],
                out_specs=pl.BlockSpec((tm_eff, tn), lambda i, j, k: (i, j)),
                scratch_shapes=[pltpu.VMEM((tm_eff, tn), jnp.float32)],
            ),
            compiler_params=pltpu.CompilerParams(
                dimension_semantics=("parallel", "parallel", "arbitrary"),
                vmem_limit_bytes=vmem_limit),
            cost_estimate=pl.CostEstimate(
                flops=flops, transcendentals=transcendentals,
                bytes_accessed=bytes_accessed),
        )(xp, w13_t, b13_t, w2p, b2p)

    out = out_pad[:M, :out_c]
    return out.reshape(orig_shape[:-1] + (out_c,))


def dsmlp_pallas(x, w1, b1, w3, b3, w2, b2, *, tm=None, **pack_kwargs):
    """Convenience wrapper (re-packs weights every call; prefer prepare_dsmlp_params +
    dsmlp_apply in real use so the repack happens once)."""
    pack = prepare_dsmlp_params(w1, b1, w3, b3, w2, b2, **pack_kwargs)
    return dsmlp_apply(x, pack, tm=tm)


# ------------------------------- reference --------------------------------- #

def dsmlp_ref(x, w1, b1, w3, b3, w2, b2):
    h1 = x @ w1 + b1
    h3 = x @ w3 + b3
    return (jax.nn.silu(h1) * h3) @ w2 + b2


def init_params(key, in_c, inter_c, out_c):
    # Deterministic synthetic init (uniform, roughly PyTorch Linear scale).
    ks = jax.random.split(key, 6)

    def lin(kw, kb, fan_in, fan_out):
        bound = 1.0 / (fan_in ** 0.5)
        w = jax.random.uniform(kw, (fan_in, fan_out), jnp.float32, -bound, bound)
        b = jax.random.uniform(kb, (fan_out,), jnp.float32, -bound, bound)
        return w, b

    w1, b1 = lin(ks[0], ks[1], in_c, inter_c)
    w3, b3 = lin(ks[2], ks[3], in_c, inter_c)
    w2, b2 = lin(ks[4], ks[5], inter_c, out_c)
    return w1, b1, w3, b3, w2, b2


if __name__ == "__main__":
    key = jax.random.PRNGKey(0)
    k1, k2, k3, k4 = jax.random.split(key, 4)

    # --- config 1: toy shapes implied by the module; bf16-MXU default, resident path.
    B, S = 2, 8
    in_c, inter_c, out_c = 32, 64, 32
    x = jax.random.normal(k1, (B, S, in_c), jnp.float32)
    params = init_params(k2, in_c, inter_c, out_c)
    ref = dsmlp_ref(x, *params)

    pack = prepare_dsmlp_params(*params)          # one-time weight repack (cache this)
    out = dsmlp_apply(x, pack)
    jax.block_until_ready(out)
    assert out.shape == ref.shape
    assert jnp.allclose(out, ref, atol=5e-2, rtol=5e-2), "mismatch (resident, bf16)"

    # f32 MXU operands -> tight tolerance.
    out_f32 = dsmlp_pallas(x, *params, mxu_dtype=jnp.float32)
    jax.block_until_ready(out_f32)
    assert jnp.allclose(out_f32, ref, atol=1e-4, rtol=1e-4), "mismatch (resident, f32)"

    # --- config 2: lane-dense shapes; exercise the (M, N, K)-tiled accumulator path
    #     (N-tiled out_channels + K-tiled inter_channels, f32 accumulator).
    B2, S2 = 2, 64
    in2, inter2, out2 = 128, 256, 256
    x2 = jax.random.normal(k3, (B2, S2, in2), jnp.float32)
    params2 = init_params(k4, in2, inter2, out2)
    ref2 = dsmlp_ref(x2, *params2)

    pack_t = prepare_dsmlp_params(*params2, force_tiled=True, tk_inter=128, tn_out=128)
    out_t = dsmlp_apply(x2, pack_t, tm=128)
    jax.block_until_ready(out_t)
    assert jnp.allclose(out_t, ref2, atol=5e-2, rtol=5e-2), "mismatch (tiled, bf16)"

    print("KERNEL_OK")
</pallas_src>

<mosaic_0001>
module attributes {stable_mosaic.version = 11 : i64} {
  func.func @_dsmlp_resident_kernel(%arg0: i32, %arg1: memref<16x128xbf16, #tpu.memory_space<vmem>>, %arg2: memref<128x256xbf16, #tpu.memory_space<vmem>>, %arg3: memref<1x256xf32, #tpu.memory_space<vmem>>, %arg4: memref<128x128xbf16, #tpu.memory_space<vmem>>, %arg5: memref<1x128xf32, #tpu.memory_space<vmem>>, %arg6: memref<16x128xf32, #tpu.memory_space<vmem>>) attributes {dimension_semantics = [#tpu.dimension_semantics<parallel>], iteration_bounds = array<i64: 1>, scalar_prefetch = 0 : i64, scratch_operands = 0 : i64, tpu.core_type = #tpu.core_type<tc>, window_params = [{transform_indices = @transform_0, window_bounds = array<i64: 16, 128>}, {pipeline_mode = #tpu.pipeline_mode<synchronous>, transform_indices = @transform_1, window_bounds = array<i64: 128, 256>}, {pipeline_mode = #tpu.pipeline_mode<synchronous>, transform_indices = @transform_2, window_bounds = array<i64: 1, 256>}, {pipeline_mode = #tpu.pipeline_mode<synchronous>, transform_indices = @transform_3, window_bounds = array<i64: 128, 128>}, {pipeline_mode = #tpu.pipeline_mode<synchronous>, transform_indices = @transform_4, window_bounds = array<i64: 1, 128>}, {transform_indices = @transform_5, window_bounds = array<i64: 16, 128>}]} {
    %c0 = arith.constant 0 : index
    %c0_0 = arith.constant 0 : index
    %0 = vector.load %arg1[%c0, %c0_0] : memref<16x128xbf16, #tpu.memory_space<vmem>>, vector<16x128xbf16>
    %c0_1 = arith.constant 0 : index
    %c0_2 = arith.constant 0 : index
    %1 = vector.load %arg2[%c0_1, %c0_2] : memref<128x256xbf16, #tpu.memory_space<vmem>>, vector<128x256xbf16>
    %cst = arith.constant dense<0.000000e+00> : vector<16x256xf32>
    %2 = tpu.matmul %0, %1, %cst {dimension_numbers = #tpu.dot_dimension_numbers<[1], [0], [0], [1], [0, 0, 1, 1], [], []>} : vector<16x128xbf16>, vector<128x256xbf16>, vector<16x256xf32> -> vector<16x256xf32>
    %c0_3 = arith.constant 0 : index
    %c0_4 = arith.constant 0 : index
    %3 = vector.load %arg3[%c0_3, %c0_4] : memref<1x256xf32, #tpu.memory_space<vmem>>, vector<1x256xf32>
    %4 = vector.broadcast %3 : vector<1x256xf32> to vector<16x256xf32>
    %5 = arith.addf %2, %4 : vector<16x256xf32>
    %6 = vector.extract_strided_slice %5 {offsets = [0, 0], sizes = [16, 128], strides = [1, 1]} : vector<16x256xf32> to vector<16x128xf32>
    %7 = vector.extract_strided_slice %5 {offsets = [0, 128], sizes = [16, 128], strides = [1, 1]} : vector<16x256xf32> to vector<16x128xf32>
    %8 = arith.negf %6 : vector<16x128xf32>
    %9 = math.exp %8 : vector<16x128xf32>
    %cst_5 = arith.constant 1.000000e+00 : f32
    %10 = vector.broadcast %cst_5 : f32 to vector<16x128xf32>
    %11 = arith.addf %10, %9 : vector<16x128xf32>
    %12 = arith.divf %10, %11 : vector<16x128xf32>
    %13 = arith.mulf %6, %12 : vector<16x128xf32>
    %14 = arith.mulf %13, %7 : vector<16x128xf32>
    %15 = arith.truncf %14 : vector<16x128xf32> to vector<16x128xbf16>
    %c0_6 = arith.constant 0 : index
    %c0_7 = arith.constant 0 : index
    %16 = vector.load %arg4[%c0_6, %c0_7] : memref<128x128xbf16, #tpu.memory_space<vmem>>, vector<128x128xbf16>
    %cst_8 = arith.constant dense<0.000000e+00> : vector<16x128xf32>
    %17 = tpu.matmul %15, %16, %cst_8 {dimension_numbers = #tpu.dot_dimension_numbers<[1], [0], [0], [1], [0, 0, 1, 1], [], []>} : vector<16x128xbf16>, vector<128x128xbf16>, vector<16x128xf32> -> vector<16x128xf32>
    %c0_9 = arith.constant 0 : index
    %c0_10 = arith.constant 0 : index
    %18 = vector.load %arg5[%c0_9, %c0_10] : memref<1x128xf32, #tpu.memory_space<vmem>>, vector<1x128xf32>
    %19 = vector.broadcast %18 : vector<1x128xf32> to vector<16x128xf32>
    %20 = arith.addf %17, %19 : vector<16x128xf32>
    %c0_11 = arith.constant 0 : index
    %c0_12 = arith.constant 0 : index
    %21 = vector.load %arg6[%c0_11, %c0_12] : memref<16x128xf32, #tpu.memory_space<vmem>>, vector<16x128xf32>
    tpu.vector_store %arg6[%c0_11, %c0_12], %20 {strides = array<i32>} : memref<16x128xf32, #tpu.memory_space<vmem>>, vector<16x128xf32>,
    return
  }
  func.func @transform_0(%arg0: i32) -> (i32, i32) {
    %c0_i32 = arith.constant 0 : i32
    %c0_i32_0 = arith.constant 0 : i32
    return %arg0, %c0_i32 : i32, i32
  }
  func.func @transform_1(%arg0: i32) -> (i32, i32) {
    %c0_i32 = arith.constant 0 : i32
    %c0_i32_0 = arith.constant 0 : i32
    %c0_i32_1 = arith.constant 0 : i32
    return %c0_i32, %c0_i32_0 : i32, i32
  }
  func.func @transform_2(%arg0: i32) -> (i32, i32) {
    %c0_i32 = arith.constant 0 : i32
    %c0_i32_0 = arith.constant 0 : i32
    %c0_i32_1 = arith.constant 0 : i32
    return %c0_i32, %c0_i32_0 : i32, i32
  }
  func.func @transform_3(%arg0: i32) -> (i32, i32) {
    %c0_i32 = arith.constant 0 : i32
    %c0_i32_0 = arith.constant 0 : i32
    %c0_i32_1 = arith.constant 0 : i32
    return %c0_i32, %c0_i32_0 : i32, i32
  }
  func.func @transform_4(%arg0: i32) -> (i32, i32) {
    %c0_i32 = arith.constant 0 : i32
    %c0_i32_0 = arith.constant 0 : i32
    %c0_i32_1 = arith.constant 0 : i32
    return %c0_i32, %c0_i32_0 : i32, i32
  }
  func.func @transform_5(%arg0: i32) -> (i32, i32) {
    %c0_i32 = arith.constant 0 : i32
    %c0_i32_0 = arith.constant 0 : i32
    return %arg0, %c0_i32 : i32, i32
  }
}

</mosaic_0001>

<bundles_post_ra>
// kernel: tpu_custom_call.1
= control target key start
LH: loop header
LB: loop body
LE: loop exit
PB: predicated region body
PF: predicated region fallthrough
CT: control target
= control target key end

     0   :  { %10 = vsyncpa [#allocation3], 0  ;;  %s631_s0 = inlined_call_operand.hbm [shape: bf16[16,128], index: 0, kind: input, shape index: {}]   ;;  %s632_s1 = inlined_call_operand.hbm [shape: bf16[128,256], index: 1, kind: input, shape index: {}]   ;;  %s633_s2 = inlined_call_operand.vmem [shape: f32[1,256], index: 2, kind: input, shape index: {}]   ;;  %s634_s3 = inlined_call_operand.hbm [shape: bf16[128,128], index: 3, kind: input, shape index: {}]   ;;  %s635_s4 = inlined_call_operand.vmem [shape: f32[1,128], index: 4, kind: input, shape index: {}]   ;;  %s636_s5 = inlined_call_operand.hbm [shape: f32[16,128], index: 5, kind: output, shape index: {}]  }
   0x1   :  { %11 = vsyncpa [#allocation6], 0 }
   0x2   :  { %12 = vsyncpa [#allocation4], 0  ;;  %s566_s18 = smov [#allocation5]  }
   0x3   :  { %s30_s19 = sshll.u32 %s566_s18, 4  ;;  %s31_s19 = int_to_ptr.vmem [resolvable:$true] %s30_s19 }
   0x4   :  { %s488_s20 = scalar_lea.vmem %s31_s19, 2048  ;;  %p493_p1 = scmp.lt.s32.totalorder %s31_s19, %s31_s19 }
   0x5   :  { %p489_p0 = scmp.ne.s32.totalorder %s31_s19, %s488_s20  ;;  %p494_p2 = scmp.lt.s32.totalorder %s488_s20, %s488_s20 }
   0x7   :  { %p495_p3 = por %p494_p2, %p493_p1 }
   0x9   :  { %p496_p4 = pnand %p495_p3, %p489_p0 }
   0xb   :  { %499 = shalt.err (!%p496_p4)
}
   0xc   :  { %s567_s21 = smov 128   ;;  %s568_s22 = smov 8  }
   0xd   :  { %36 = dma.hbm_to_vmem [thread:$0]  %s632_s1, 2048, %s31_s19, [#allocation6], %s567_s21, %s567_s21, %s568_s22  }
   0xe   :  { %s569_s25 = smov [#allocation2]  }
   0xf   :  { %s18_s26 = sshll.u32 %s569_s25, 4  ;;  %s19_s26 = int_to_ptr.vmem [resolvable:$true] %s18_s26 }
  0x10   :  { %s508_s27 = scalar_lea.vmem %s19_s26, 128  ;;  %p513_p6 = scmp.lt.s32.totalorder %s19_s26, %s19_s26 }
  0x11   :  { %p509_p5 = scmp.ne.s32.totalorder %s19_s26, %s508_s27  ;;  %p514_p7 = scmp.lt.s32.totalorder %s508_s27, %s508_s27 }
  0x13   :  { %p515_p8 = por %p514_p7, %p513_p6 }
  0x15   :  { %p516_p9 = pnand %p515_p8, %p509_p5 }
  0x17   :  { %519 = shalt.err (!%p516_p9)
}
  0x18   :  { %s570_s28 = smov 64   ;;  %s571_s29 = smov 4  }
  0x19   :  { %24 = dma.hbm_to_vmem [thread:$0]  %s631_s0, 128, %s19_s26, [#allocation3], %s570_s28, %s570_s28, %s571_s29  }
  0x1a   :  { %s572_s7 = smov [#allocation7]  }
  0x1b   :  { %s44_s8 = sshll.u32 %s572_s7, 4  ;;  %s45_s8 = int_to_ptr.vmem [resolvable:$true] %s44_s8 }
  0x1c   :  { %s528_s1 = scalar_lea.vmem %s45_s8, 1024  ;;  %p533_p11 = scmp.lt.s32.totalorder %s45_s8, %s45_s8 }
  0x1d   :  { %p529_p10 = scmp.ne.s32.totalorder %s45_s8, %s528_s1  ;;  %p534_p12 = scmp.lt.s32.totalorder %s528_s1, %s528_s1 }
  0x1f   :  { %p535_p13 = por %p534_p12, %p533_p11 }
  0x21   :  { %p536_p0 = pnand %p535_p13, %p529_p10 }
  0x23   :  { %539 = shalt.err (!%p536_p0)
}
  0x24   :  { %50 = dma.hbm_to_vmem [thread:$0]  %s634_s3, 1024, %s45_s8, [#allocation6], %s570_s28, %s570_s28, %s571_s29  }
  0x25   :  { %560 = dma.done.wait [#allocation3], 128  }
  0x26   :  { %561 = vsyncadd [#allocation3], 4294967168 }
  0x27   :  { %562 = dma.done.wait [#allocation6], 3072  }
  0x28   :  { %563 = vsyncadd [#allocation6], 4294964224  ;;  %v573_v0 = vmov 0   ;;  %v439_v1 = vld [vmem:[#allocation5 + $0x74] ss:$8 sps:$4 sm:$0xff]   ;;  %v574_v19 = vmov 0.0   ;;  %v83_v27 = vlaneseq }
  0x29   :  { %211 = vmatprep.mubr.bf16.mxu0 %v573_v0  ;;  %v441_v2 = vld [vmem:[#allocation5 + $0x70] ss:$8 sps:$4 sm:$0xff]   ;;  %179 = vmatprep.subr.bf16.mxu0 %v439_v1  ;;  %v442_v3 = vld [vmem:[#allocation5 + $0x64] ss:$8 sps:$4 sm:$0xff]   ;;  %v444_v4 = vld [vmem:[#allocation5 + $0x60] ss:$8 sps:$4 sm:$0xff]  }
  0x2a   :  { %180 = vmatpush1.bf16.msra.mxu0 %v441_v2  ;;  %v445_v5 = vld [vmem:[#allocation5 + $0x54] ss:$8 sps:$4 sm:$0xff]   ;;  %v447_v6 = vld [vmem:[#allocation5 + $0x50] ss:$8 sps:$4 sm:$0xff]   ;;  %v448_v7 = vld [vmem:[#allocation5 + $0x44] ss:$8 sps:$4 sm:$0xff]   ;;  %408 = vmatprep.subr.bf16.mxu1 %v574_v19 }
  0x2b   :  { %181 = vmatprep.subr.bf16.mxu0 %v442_v3  ;;  %v450_v8 = vld [vmem:[#allocation5 + $0x40] ss:$8 sps:$4 sm:$0xff]   ;;  %v451_v9 = vld [vmem:[#allocation5 + $0x34] ss:$8 sps:$4 sm:$0xff]   ;;  %v453_v10 = vld [vmem:[#allocation5 + $0x30] ss:$8 sps:$4 sm:$0xff]  }
  0x2c   :  { %v454_v11 = vld [vmem:[#allocation5 + $0x24] ss:$8 sps:$4 sm:$0xff]   ;;  %v456_v12 = vld [vmem:[#allocation5 + $0x20] ss:$8 sps:$4 sm:$0xff]   ;;  %v457_v13 = vld [vmem:[#allocation5 + $0x14] ss:$8 sps:$4 sm:$0xff]  }
  0x2d   :  { %v459_v14 = vld [vmem:[#allocation5 + $0x10] ss:$8 sps:$4 sm:$0xff]   ;;  %v460_v15 = vld [vmem:[#allocation5 + $0x4] ss:$8 sps:$4 sm:$0xff]   ;;  %v462_v16 = vld [vmem:[#allocation5] ss:$8 sps:$4 sm:$0xff]  }
  0x2e   :  { %182 = vmatpush1.bf16.msra.mxu0 %v444_v4  ;;  %v463_v17 = vld [vmem:[#allocation2] sm:$0xff]   ;;  %v465_v20 = vld [vmem:[#allocation7 + $0x30] sm:$0xff]   ;;  %v466_v21 = vld [vmem:[#allocation7 + $0x28] sm:$0xff]   ;;  %vm575_vm0 = vmmov 0   ;;  %v84_v28 = vshrl.u32 %v83_v27, 7  ;;  %s576_s12 = smov [#allocation8]  }
  0x2f   :  { %183 = vmatprep.subr.bf16.mxu0 %v445_v5  ;;  %v464_v18 = vld [vmem:[#allocation7 + $0x38] sm:$0xff]   ;;  %v467_v22 = vld [vmem:[#allocation7 + $0x20] sm:$0xff]   ;;  %v469_v24 = vld [vmem:[#allocation7 + $0x10] sm:$0xff]   ;;  %424 = vmatprep.mubr.msk.bf16.mxu1 %vm575_vm0, %v574_v19  ;;  %s358_s13 = sshll.u32 %s576_s12, 4  ;;  %s359_s13 = int_to_ptr.vmem [resolvable:$true] %s358_s13 }
  0x30   :  { %409 = vmatpush3.bf16.msra.mxu1 %v464_v18  ;;  %v468_v23 = vld [vmem:[#allocation7 + $0x18] sm:$0xff]   ;;  %v470_v25 = vld [vmem:[#allocation7 + $0x8] sm:$0xff]   ;;  %v471_v26 = vld [vmem:[#allocation7] sm:$0xff]   ;;  %v85_v29 = vsub.s32 0, %v84_v28  ;;  %v89_v43 = vsub.s32 1, %v84_v28  ;;  %s540_s14 = scalar_lea.vmem %s359_s13, 256  ;;  %p545_p2 = scmp.lt.s32.totalorder %s359_s13, %s359_s13 }
  0x31   :  { %410 = vmatprep.subr.bf16.mxu1 %v574_v19  ;;  %v81_v30 = vld [vmem:[%s633_s2] sm:$0x3]  ;;  %p541_p1 = scmp.ne.s32.totalorder %s359_s13, %s540_s14  ;;  %p546_p3 = scmp.lt.s32.totalorder %s540_s14, %s540_s14 }
  0x32   :  { %184 = vmatpush1.bf16.msra.mxu0 %v447_v6  ;;  %v86_v31 = vrot.slane %v81_v30, %v85_v29  ;;  %v90_v45 = vrot.slane %v81_v30, %v89_v43  ;;  %v390_v55 = vld [vmem:[%s635_s4] ss:$0 sm:$0xff] }
  0x33   :  { %185 = vmatprep.subr.bf16.mxu0 %v448_v7  ;;  %p547_p4 = por %p546_p3, %p545_p2 }
  0x34   :  { %411 = vmatpush3.bf16.msra.mxu1 %v465_v20 }
  0x35   :  { %412 = vmatprep.subr.bf16.mxu1 %v574_v19  ;;  %p548_p5 = pnand %p547_p4, %p541_p1 }
  0x36   :  { %186 = vmatpush1.bf16.msra.mxu0 %v450_v8 }
  0x37   :  { %187 = vmatprep.subr.bf16.mxu0 %v451_v9 }
  0x38   :  { %413 = vmatpush3.bf16.msra.mxu1 %v466_v21 }
  0x39   :  { %414 = vmatprep.subr.bf16.mxu1 %v574_v19 }
  0x3a   :  { %188 = vmatpush1.bf16.msra.mxu0 %v453_v10 }
  0x3b   :  { %189 = vmatprep.subr.bf16.mxu0 %v454_v11 }
  0x3c   :  { %415 = vmatpush3.bf16.msra.mxu1 %v467_v22 }
  0x3d   :  { %416 = vmatprep.subr.bf16.mxu1 %v574_v19 }
  0x3e   :  { %190 = vmatpush1.bf16.msra.mxu0 %v456_v12 }
  0x3f   :  { %191 = vmatprep.subr.bf16.mxu0 %v457_v13 }
  0x40   :  { %417 = vmatpush3.bf16.msra.mxu1 %v468_v23 }
  0x41   :  { %418 = vmatprep.subr.bf16.mxu1 %v574_v19 }
  0x42   :  { %192 = vmatpush1.bf16.msra.mxu0 %v459_v14 }
  0x43   :  { %193 = vmatprep.subr.bf16.mxu0 %v460_v15 }
  0x44   :  { %419 = vmatpush3.bf16.msra.mxu1 %v469_v24 }
  0x45   :  { %420 = vmatprep.subr.bf16.mxu1 %v574_v19 }
  0x46   :  { %194 = vmatpush1.bf16.msra.mxu0 %v462_v16 }
  0x48   :  { %421 = vmatpush3.bf16.msra.mxu1 %v470_v25 }
  0x49   :  { %212 = vmatmul.mubr.bf16.vlgmr.msra.gmra.mxu0 %v463_v17  ;;  %422 = vmatprep.subr.bf16.mxu1 %v574_v19 }
  0x4c   :  { %423 = vmatpush3.bf16.msra.mxu1 %v471_v26 }
 0x109   :  { %v213_v32 = vpop.f32.mrf.mxu0 }
 0x10a   :  { %v214_v33 = vadd.f32 %v213_v32, %v86_v31 }
 0x10b   :  { %v215_v34 = vpop.f32.mrf.mxu0 }
 0x10c   :  { %v388_v35 = vmul.f32 -1.442695, %v214_v33  ;;  %v216_v49 = vadd.f32 %v215_v34, %v90_v45 }
 0x10d   :  { %v217_v36 = vpop.f32.mrf.mxu0 }
 0x10e   :  { %472 = vpow2.f32 %v388_v35  ;;  %v218_v37 = vadd.f32 %v217_v36, %v86_v31 }
 0x10f   :  { %v219_v46 = vpop.f32.mrf.mxu0 }
 0x110   :  { %v389_v38 = vmul.f32 -1.442695, %v218_v37  ;;  %v220_v51 = vadd.f32 %v219_v46, %v90_v45 }
 0x112   :  { %474 = vpow2.f32 %v389_v38 }
 0x11b   :  { %v473_v39 = vpop.eup %472 }
 0x11c   :  { %v228_v40 = vadd.f32 1.0, %v473_v39 }
 0x11e   :  { %476 = vrcp.f32 %v228_v40 }
 0x11f   :  { %v475_v41 = vpop.eup %474 }
 0x120   :  { %v229_v42 = vadd.f32 1.0, %v475_v41 }
 0x122   :  { %478 = vrcp.f32 %v229_v42 }
 0x12b   :  { %v477_v44 = vpop.eup %476 }
 0x12c   :  { %v234_v47 = vmul.f32 %v477_v44, %v214_v33 }
 0x12e   :  { %v236_v52 = vmul.f32 %v234_v47, %v216_v49 }
 0x12f   :  { %v479_v48 = vpop.eup %478 }
 0x130   :  { %v235_v50 = vmul.f32 %v479_v48, %v218_v37 }
 0x132   :  { %v237_v53 = vmul.f32 %v235_v50, %v220_v51 }
 0x134   :  { %v238_v54 = vpack.c.bf16 %v237_v53, %v236_v52 }
 0x136   :  { %425 = vmatmul.mubr.bf16.vlgmr.msra.gmra.mxu1 %v238_v54 }
 0x1f6   :  { %v344_v56 = vpop.f32.mrf.mxu1 }
 0x1f7   :  { %v345_v57 = vadd.f32 %v390_v55, %v344_v56 }
 0x1f8   :  { %v426_v58 = vpop.f32.mrf.mxu1 }
 0x1f9   :  { %351 = vst [vmem:[#allocation8] sm:$0xff] %v345_v57 }
 0x1fa   :  { %v347_v59 = vpop.f32.mrf.mxu1 }
 0x1fb   :  { %v348_v60 = vadd.f32 %v390_v55, %v347_v59 }
 0x1fc   :  { %v427_v61 = vpop.f32.mrf.mxu1 }
 0x1fd   :  { %352 = vst [vmem:[#allocation8 + $0x8] sm:$0xff] %v348_v60 }
 0x1fe   :  { %551 = shalt.err (!%p548_p5)
}
 0x1ff   :  { %364 = dma.vmem_to_hbm [thread:$0]  %s359_s13, 256, %s636_s5, [#allocation4], %s567_s21, %s567_s21, %s568_s22  }
 0x200   :  { %564 = dma.done.wait [#allocation4], 256  }
 0x201   :  { %565 = vsyncadd [#allocation4], 4294967040 }
 0x202   :  { %368 = vsyncpa [#allocation3], 1 }
 0x203   :  { %369 = vsyncpa [#allocation6], 1 }
 0x204   :  { %370 = vsyncpa [#allocation4], 1 }

</bundles_post_ra>
